<compile_context>
chip_gen: v7x
topology: tpu7x:2x2x1
jax: 0.10.0
libtpu: 0.0.40
codegen_flags: <defaults>
</compile_context>

<pallas_src>
from functools import partial

import jax
import jax.numpy as jnp
from jax.experimental import pallas as pl
from jax.experimental.pallas import tpu as pltpu

# Generous scoped-VMEM budget; well below v7x's 64 MiB physical, plenty on v5e/v6e.
_VMEM_LIMIT = 48 * 1024 * 1024


# ------------------------------ tiling helper -------------------------------

def _pick_tile(dim, pref, align):
    """Largest `align`-multiple tile <= `pref` that evenly divides `dim`.
    Falls back to the full dimension (full-extent blocks are always legal)."""
    if dim <= pref:
        return dim
    t = (pref // align) * align
    while t >= align:
        if dim % t == 0:
            return t
        t -= align
    return dim  # full-extent fallback; fine at the shapes used here


# ------------------------------ tiled matmul ---------------------------------

def _matmul_kernel(x_ref, w_ref, o_ref, acc_ref):
    @pl.when(pl.program_id(2) == 0)
    def _init():
        acc_ref[...] = jnp.zeros(acc_ref.shape, jnp.float32)

    acc_ref[...] += jnp.dot(x_ref[...], w_ref[...],
                            preferred_element_type=jnp.float32)

    @pl.when(pl.program_id(2) == pl.num_programs(2) - 1)
    def _finalize():
        o_ref[...] = acc_ref[...].astype(o_ref.dtype)


def pallas_matmul(x, w, out_dtype=jnp.bfloat16,
                  tm_pref=512, tn_pref=512, tk_pref=512):
    """x: (M, K) @ w: (K, N) -> (M, N). bf16 inputs, f32 accumulation."""
    M, K = x.shape
    K2, N = w.shape
    assert K == K2
    tm = _pick_tile(M, tm_pref, 16)    # bf16 packs 2 rows/sublane -> align 16
    tn = _pick_tile(N, tn_pref, 128)
    tk = _pick_tile(K, tk_pref, 128)
    grid = (M // tm, N // tn, K // tk)
    return pl.pallas_call(
        _matmul_kernel,
        out_shape=jax.ShapeDtypeStruct((M, N), out_dtype),
        grid=grid,
        in_specs=[pl.BlockSpec((tm, tk), lambda i, j, k: (i, k)),
                  pl.BlockSpec((tk, tn), lambda i, j, k: (k, j))],
        out_specs=pl.BlockSpec((tm, tn), lambda i, j, k: (i, j)),
        scratch_shapes=[pltpu.VMEM((tm, tn), jnp.float32)],
        compiler_params=pltpu.CompilerParams(
            dimension_semantics=("parallel", "parallel", "arbitrary"),
            vmem_limit_bytes=_VMEM_LIMIT),
    )(x, w)


# ----------------------- fused RMSNorm -> matmul -----------------------------

def _rmsnorm_matmul_kernel(x_ref, g_ref, w_ref, o_ref, xn_ref, *, eps):
    # RMSNorm computed once per row block (j == 0) into a bf16 scratch; every
    # N tile of this row block reuses it (N axis is the fast, "arbitrary" axis).
    @pl.when(pl.program_id(1) == 0)
    def _norm():
        x = x_ref[...].astype(jnp.float32)
        var = jnp.mean(x * x, axis=-1, keepdims=True)
        xn_ref[...] = (x * jax.lax.rsqrt(var + eps)
                       * g_ref[...]).astype(xn_ref.dtype)

    o_ref[...] = jnp.dot(xn_ref[...], w_ref[...],
                         preferred_element_type=jnp.float32).astype(o_ref.dtype)


def pallas_rmsnorm_matmul(x, gamma, w, eps=1e-6, out_dtype=jnp.bfloat16,
                          tm_pref=512, tn_pref=512):
    """RMSNorm(x) @ w. x: (M, K) normalized over K (the LoRA rank), w: (K, N)."""
    M, K = x.shape
    K2, N = w.shape
    assert K == K2
    tm = _pick_tile(M, tm_pref, 16)
    tn = _pick_tile(N, tn_pref, 128)
    g2 = gamma.reshape(1, K).astype(jnp.float32)
    return pl.pallas_call(
        partial(_rmsnorm_matmul_kernel, eps=eps),
        out_shape=jax.ShapeDtypeStruct((M, N), out_dtype),
        grid=(M // tm, N // tn),
        in_specs=[pl.BlockSpec((tm, K), lambda i, j: (i, 0)),
                  pl.BlockSpec((1, K), lambda i, j: (0, 0)),
                  pl.BlockSpec((K, tn), lambda i, j: (0, j))],
        out_specs=pl.BlockSpec((tm, tn), lambda i, j: (i, j)),
        scratch_shapes=[pltpu.VMEM((tm, K), w.dtype)],
        compiler_params=pltpu.CompilerParams(
            dimension_semantics=("parallel", "arbitrary"),
            vmem_limit_bytes=_VMEM_LIMIT),
    )(x, g2, w)


# ------------------- head-packed flash (causal) attention --------------------

def _flash_attn_kernel(q_ref, k_ref, v_ref, o_ref, m_sc, l_sc, acc_sc,
                       *, scale, tq, tk):
    qi = pl.program_id(1)
    ki = pl.program_id(2)
    q_start = qi * tq
    k_start = ki * tk
    H, _, Dv = acc_sc.shape

    @pl.when(ki == 0)
    def _init():
        m_sc[...] = jnp.full(m_sc.shape, -jnp.inf, jnp.float32)
        l_sc[...] = jnp.zeros(l_sc.shape, jnp.float32)
        acc_sc[...] = jnp.zeros(acc_sc.shape, jnp.float32)

    def _update(apply_mask):
        q = q_ref[0]                     # (tq, H, Dq) bf16
        k = k_ref[0]                     # (tk, H, Dq) bf16
        v = v_ref[0]                     # (tk, H, Dv) bf16
        s = jnp.einsum("qhd,khd->hqk", q, k,
                       preferred_element_type=jnp.float32) * scale   # (H, tq, tk)
        if apply_mask:
            q_pos = q_start + jax.lax.broadcasted_iota(jnp.int32, (tq, tk), 0)
            k_pos = k_start + jax.lax.broadcasted_iota(jnp.int32, (tq, tk), 1)
            s = jnp.where((k_pos <= q_pos)[None, :, :], s, -jnp.inf)
        m_prev = m_sc[...]
        m_new = jnp.maximum(m_prev, jnp.max(s, axis=-1, keepdims=True))
        alpha = jnp.exp(m_prev - m_new)
        p = jnp.exp(s - m_new)
        l_sc[...] = alpha * l_sc[...] + jnp.sum(p, axis=-1, keepdims=True)
        acc_sc[...] = alpha * acc_sc[...] + jnp.einsum(
            "hqk,khd->hqd", p.astype(v.dtype), v,
            preferred_element_type=jnp.float32)
        m_sc[...] = m_new

    # ki == 0 always has at least one unmasked column per row (k_pos starts at 0),
    # so m/l are finite before finalize. The DMA clamp never changes which ki run.
    has_work = k_start <= q_start + (tq - 1)
    below_diag = k_start + (tk - 1) <= q_start

    @pl.when(below_diag)                 # interior tile: no mask work at all
    def _full_tile():
        _update(False)

    @pl.when(jnp.logical_and(has_work, jnp.logical_not(below_diag)))
    def _diag_tile():                    # diagonal-straddling tile: masked path
        _update(True)

    @pl.when(ki == pl.num_programs(2) - 1)
    def _finalize():
        inv_l = pl.reciprocal(l_sc[...], approx=True)
        out = acc_sc[...] * inv_l                                  # (H, tq, Dv)
        out = jnp.transpose(out, (1, 0, 2)).reshape(tq, H * Dv)    # lane-dense slab
        o_ref[0] = out.astype(o_ref.dtype)


def pallas_flash_attention(q, k, v, scale, tq_pref=256, tk_pref=256):
    """Head-packed causal flash attention.

    q, k: (B, S, H, Dq); v: (B, S, H, Dv)  ->  (B, S, H*Dv).
    Online softmax over the KV axis; upper-triangle K/V tiles are neither
    fetched (index_map clamp) nor computed (pl.when skip)."""
    B, S, H, Dq = q.shape
    Dv = v.shape[-1]
    tq = _pick_tile(S, tq_pref, 16)
    tk = _pick_tile(S, tk_pref, 16)
    grid = (B, S // tq, S // tk)

    def q_index(b, qi, ki):
        return (b, qi, 0, 0)

    def kv_index(b, qi, ki):
        # Clamp to the last KV tile this query block needs; Pallas dedups the DMA
        # when the block index repeats, so causal-skipped tiles cost no HBM traffic.
        last_needed = ((qi + 1) * tq - 1) // tk
        return (b, jnp.minimum(ki, last_needed), 0, 0)

    def o_index(b, qi, ki):
        return (b, qi, 0)

    return pl.pallas_call(
        partial(_flash_attn_kernel, scale=scale, tq=tq, tk=tk),
        out_shape=jax.ShapeDtypeStruct((B, S, H * Dv), q.dtype),
        grid=grid,
        in_specs=[pl.BlockSpec((1, tq, H, Dq), q_index),
                  pl.BlockSpec((1, tk, H, Dq), kv_index),
                  pl.BlockSpec((1, tk, H, Dv), kv_index)],
        out_specs=pl.BlockSpec((1, tq, H * Dv), o_index),
        scratch_shapes=[pltpu.VMEM((H, tq, 1), jnp.float32),    # running max m
                        pltpu.VMEM((H, tq, 1), jnp.float32),    # running sum l
                        pltpu.VMEM((H, tq, Dv), jnp.float32)],  # output accumulator
        compiler_params=pltpu.CompilerParams(
            dimension_semantics=("parallel", "parallel", "arbitrary"),
            vmem_limit_bytes=_VMEM_LIMIT),
    )(q, k, v)


# --------------------------------- JAX glue ----------------------------------

def apply_rotary_emb(x, cos, sin):
    """x: (b, s, h, d) with d even; cos/sin: (s, d//2).
    Matches torch.view_as_complex on consecutive (real, imag) pairs."""
    b, s, h, d = x.shape
    xr = x[..., 0::2].astype(jnp.float32)
    xi = x[..., 1::2].astype(jnp.float32)
    c = cos.reshape(1, s, 1, d // 2)
    sn = sin.reshape(1, s, 1, d // 2)
    yr = xr * c - xi * sn
    yi = xr * sn + xi * c
    y = jnp.stack([yr, yi], axis=-1).reshape(b, s, h, d)
    return y.astype(x.dtype)


def precompute_freqs(seqlen, rope_dim, theta=10000.0):
    inv = 1.0 / (theta ** (jnp.arange(0, rope_dim, 2, dtype=jnp.float32) / rope_dim))
    t = jnp.arange(seqlen, dtype=jnp.float32)
    ang = jnp.outer(t, inv)  # (seqlen, rope_dim//2)
    return jnp.cos(ang), jnp.sin(ang)


class MLAConfig:
    dim = 32
    n_heads = 4
    q_lora_rank = 16
    kv_lora_rank = 16
    qk_nope_head_dim = 16
    qk_rope_head_dim = 8
    v_head_dim = 16
    norm_eps = 1e-6
    # max_seq_len <= original_seq_len -> no mscale correction
    qk_head_dim = qk_nope_head_dim + qk_rope_head_dim
    softmax_scale = qk_head_dim ** (-0.5)


def init_params(key, cfg):
    def trunc(key, shape, std=0.02):
        return std * jax.random.truncated_normal(key, -2.0, 2.0, shape, jnp.float32)

    def lin(k, in_f, out_f):
        # nn.Linear stores (out, in); pre-transpose to (in, out) and cast to bf16.
        return trunc(k, (out_f, in_f)).T.astype(jnp.bfloat16)

    ks = jax.random.split(key, 5)
    return {
        "wq_a": lin(ks[0], cfg.dim, cfg.q_lora_rank),
        "wq_b": lin(ks[1], cfg.q_lora_rank, cfg.n_heads * cfg.qk_head_dim),
        "wkv_a": lin(ks[2], cfg.dim, cfg.kv_lora_rank + cfg.qk_rope_head_dim),
        "wkv_b": lin(ks[3], cfg.kv_lora_rank,
                     cfg.n_heads * (cfg.qk_nope_head_dim + cfg.v_head_dim)),
        "wo": lin(ks[4], cfg.n_heads * cfg.v_head_dim, cfg.dim),
        "q_norm_w": jnp.ones((cfg.q_lora_rank,), jnp.float32),
        "kv_norm_w": jnp.ones((cfg.kv_lora_rank,), jnp.float32),
    }


def mla_forward(params, x, cos, sin, cfg):
    b, s, dim = x.shape
    H = cfg.n_heads
    nope, rope, dv = cfg.qk_nope_head_dim, cfg.qk_rope_head_dim, cfg.v_head_dim
    dq = cfg.qk_head_dim
    x2 = x.reshape(b * s, dim).astype(jnp.bfloat16)

    # --- query path: wq_a -> (RMSNorm fused into) wq_b ---
    q_lat = pallas_matmul(x2, params["wq_a"])                               # (BS, r_q)
    q = pallas_rmsnorm_matmul(q_lat, params["q_norm_w"], params["wq_b"],
                              cfg.norm_eps)                                 # (BS, H*dq)
    q = q.reshape(b, s, H, dq)
    q_nope, q_pe = q[..., :nope], q[..., nope:]
    q_pe = apply_rotary_emb(q_pe, cos, sin)
    # TODO(synk): fuse RoPE + this concat into the wq_b / wkv_b kernel epilogues.
    q = jnp.concatenate([q_nope, q_pe], axis=-1)                            # (b, s, H, dq)

    # --- key/value path: wkv_a -> split -> (RMSNorm fused into) wkv_b ---
    kv = pallas_matmul(x2, params["wkv_a"]).reshape(b, s, -1)
    kv_lat, k_pe = kv[..., :cfg.kv_lora_rank], kv[..., cfg.kv_lora_rank:]
    k_pe = apply_rotary_emb(k_pe[:, :, None, :], cos, sin)                  # (b, s, 1, rope)
    kv_out = pallas_rmsnorm_matmul(kv_lat.reshape(b * s, cfg.kv_lora_rank),
                                   params["kv_norm_w"], params["wkv_b"],
                                   cfg.norm_eps)                            # (BS, H*(nope+dv))
    kv_out = kv_out.reshape(b, s, H, nope + dv)
    k_nope, v = kv_out[..., :nope], kv_out[..., nope:]
    k = jnp.concatenate(
        [k_nope, jnp.broadcast_to(k_pe, (b, s, H, rope)).astype(k_nope.dtype)],
        axis=-1)                                                            # (b, s, H, dq)

    # --- head-packed causal flash SDPA: (b, s, H, d) in -> (b, s, H*dv) out ---
    out = pallas_flash_attention(q, k, v, cfg.softmax_scale)                # (b, s, H*dv)

    # --- output projection (attention output is already the (BS, H*dv) slab wo wants) ---
    y = pallas_matmul(out.reshape(b * s, H * dv), params["wo"], out_dtype=jnp.float32)
    return y.reshape(b, s, dim)


if __name__ == "__main__":
    cfg = MLAConfig()
    bsz, seqlen = 2, 8

    key = jax.random.PRNGKey(0)
    k_param, k_x = jax.random.split(key)
    params = init_params(k_param, cfg)
    x = jax.random.normal(k_x, (bsz, seqlen, cfg.dim), jnp.float32)
    cos, sin = precompute_freqs(seqlen, cfg.qk_rope_head_dim)

    y = mla_forward(params, x, cos, sin, cfg)
    y = jax.block_until_ready(y)
    assert y.shape == (bsz, seqlen, cfg.dim)
    assert bool(jnp.all(jnp.isfinite(y)))
    print("KERNEL_OK")
</pallas_src>

<mosaic_0001>
module attributes {stable_mosaic.version = 11 : i64} {
  func.func @_matmul_kernel(%arg0: i32, %arg1: i32, %arg2: i32, %arg3: memref<16x32xbf16, #tpu.memory_space<vmem>>, %arg4: memref<32x16xbf16, #tpu.memory_space<vmem>>, %arg5: memref<16x16xbf16, #tpu.memory_space<vmem>>, %arg6: memref<16x16xf32, #tpu.memory_space<vmem>>) attributes {dimension_semantics = [#tpu.dimension_semantics<parallel>, #tpu.dimension_semantics<parallel>, #tpu.dimension_semantics<arbitrary>], iteration_bounds = array<i64: 1, 1, 1>, scalar_prefetch = 0 : i64, scratch_operands = 1 : i64, tpu.core_type = #tpu.core_type<tc>, window_params = [{transform_indices = @transform_0, window_bounds = array<i64: 16, 32>}, {transform_indices = @transform_1, window_bounds = array<i64: 32, 16>}, {transform_indices = @transform_2, window_bounds = array<i64: 16, 16>}]} {
    %c0_i32 = arith.constant 0 : i32
    %0 = arith.cmpi eq, %arg2, %c0_i32 : i32
    %1 = arith.extui %0 : i1 to i32
    %c0_i32_0 = arith.constant 0 : i32
    %2 = arith.cmpi ne, %1, %c0_i32_0 : i32
    scf.if %2 {
      %cst_10 = arith.constant 0.000000e+00 : f32
      %12 = vector.broadcast %cst_10 : f32 to vector<16x16xf32>
      %c0_11 = arith.constant 0 : index
      %c0_12 = arith.constant 0 : index
      %13 = vector.load %arg6[%c0_11, %c0_12] : memref<16x16xf32, #tpu.memory_space<vmem>>, vector<16x16xf32>
      tpu.vector_store %arg6[%c0_11, %c0_12], %12 {strides = array<i32>} : memref<16x16xf32, #tpu.memory_space<vmem>>, vector<16x16xf32>,
    } else {
    }
    %c0 = arith.constant 0 : index
    %c0_1 = arith.constant 0 : index
    %3 = vector.load %arg6[%c0, %c0_1] : memref<16x16xf32, #tpu.memory_space<vmem>>, vector<16x16xf32>
    %c0_2 = arith.constant 0 : index
    %c0_3 = arith.constant 0 : index
    %4 = vector.load %arg3[%c0_2, %c0_3] : memref<16x32xbf16, #tpu.memory_space<vmem>>, vector<16x32xbf16>
    %c0_4 = arith.constant 0 : index
    %c0_5 = arith.constant 0 : index
    %5 = vector.load %arg4[%c0_4, %c0_5] : memref<32x16xbf16, #tpu.memory_space<vmem>>, vector<32x16xbf16>
    %cst = arith.constant dense<0.000000e+00> : vector<16x16xf32>
    %6 = tpu.matmul %4, %5, %cst {dimension_numbers = #tpu.dot_dimension_numbers<[1], [0], [0], [1], [0, 0, 1, 1], [], []>} : vector<16x32xbf16>, vector<32x16xbf16>, vector<16x16xf32> -> vector<16x16xf32>
    %7 = arith.addf %3, %6 : vector<16x16xf32>
    %c0_6 = arith.constant 0 : index
    %c0_7 = arith.constant 0 : index
    %8 = vector.load %arg6[%c0_6, %c0_7] : memref<16x16xf32, #tpu.memory_space<vmem>>, vector<16x16xf32>
    tpu.vector_store %arg6[%c0_6, %c0_7], %7 {strides = array<i32>} : memref<16x16xf32, #tpu.memory_space<vmem>>, vector<16x16xf32>,
    %c0_i32_8 = arith.constant 0 : i32
    %9 = arith.cmpi eq, %arg2, %c0_i32_8 : i32
    %10 = arith.extui %9 : i1 to i32
    %c0_i32_9 = arith.constant 0 : i32
    %11 = arith.cmpi ne, %10, %c0_i32_9 : i32
    scf.if %11 {
      %c0_10 = arith.constant 0 : index
      %c0_11 = arith.constant 0 : index
      %12 = vector.load %arg6[%c0_10, %c0_11] : memref<16x16xf32, #tpu.memory_space<vmem>>, vector<16x16xf32>
      %13 = arith.truncf %12 : vector<16x16xf32> to vector<16x16xbf16>
      %c0_12 = arith.constant 0 : index
      %c0_13 = arith.constant 0 : index
      %14 = vector.load %arg5[%c0_12, %c0_13] : memref<16x16xbf16, #tpu.memory_space<vmem>>, vector<16x16xbf16>
      tpu.vector_store %arg5[%c0_12, %c0_13], %13 {strides = array<i32>} : memref<16x16xbf16, #tpu.memory_space<vmem>>, vector<16x16xbf16>,
    } else {
    }
    return
  }
  func.func @transform_0(%arg0: i32, %arg1: i32, %arg2: i32) -> (i32, i32) {
    %c0_i32 = arith.constant 0 : i32
    return %arg0, %arg2 : i32, i32
  }
  func.func @transform_1(%arg0: i32, %arg1: i32, %arg2: i32) -> (i32, i32) {
    %c0_i32 = arith.constant 0 : i32
    return %arg2, %arg1 : i32, i32
  }
  func.func @transform_2(%arg0: i32, %arg1: i32, %arg2: i32) -> (i32, i32) {
    %c0_i32 = arith.constant 0 : i32
    return %arg0, %arg1 : i32, i32
  }
}

</mosaic_0001>

<bundles_post_ra>
// kernel: tpu_custom_call.1
= control target key start
LH: loop header
LB: loop body
LE: loop exit
PB: predicated region body
PF: predicated region fallthrough
CT: control target
= control target key end

     0   :  { %v178_v1 = vmov 0.0   ;;  %vm179_vm0 = vmmov 0   ;;  %vm17_vm1 = vcmask 130048   ;;  %s223_s0 = inlined_call_operand.vmem [shape: bf16[16,32], index: 0, kind: input, shape index: {}]   ;;  %s224_s1 = inlined_call_operand.vmem [shape: bf16[32,16], index: 1, kind: input, shape index: {}]   ;;  %s225_s2 = inlined_call_operand.hbm [shape: bf16[16,16], index: 2, kind: output, shape index: {}]  }
   0x1   :  { %v151_v0 = vld [vmem:[%s224_s1] sm:$0xff]   ;;  %138 = vmatprep.subr.bf16.mxu0 %v178_v1  ;;  %v152_v2 = vld [vmem:[%s224_s1 + $0x8] sm:$0xff]   ;;  %142 = vmatprep.mubr.msk.bf16.mxu0 %vm179_vm0, %v178_v1 }
   0x2   :  { %139 = vmatpush3.bf16.msra.mxu0 %v151_v0 }
   0x3   :  { %140 = vmatprep.subr.bf16.mxu0 %v178_v1 }
   0x4   :  { %7 = vsyncpa [#allocation4], 0  ;;  %18 = vst.msk [vmem:[#allocation2] sm:$0xff] %vm17_vm1, %v178_v1  ;;  %v153_v3 = vld [vmem:[%s223_s0] sm:$0xff]   ;;  %vm45_vm2 = vcmask 261120   ;;  %s180_s1 = smov [#allocation3]  }
   0x5   :  { %19 = vst.msk [vmem:[#allocation2 + $0x8] sm:$0xff] %vm17_vm1, %v178_v1  ;;  %s116_s15 = sshll.u32 %s180_s1, 4  ;;  %vm108_vm3 = vcmask 125952   ;;  %s117_s15 = int_to_ptr.vmem [resolvable:$true] %s116_s15 }
   0x6   :  { %141 = vmatpush3.bf16.msra.mxu0 %v152_v2  ;;  %s154_s0 = scalar_lea.vmem %s117_s15, 128  ;;  %p159_p1 = scmp.lt.s32.totalorder %s117_s15, %s117_s15 }
   0x7   :  { %p155_p0 = scmp.ne.s32.totalorder %s117_s15, %s154_s0  ;;  %p160_p2 = scmp.lt.s32.totalorder %s154_s0, %s154_s0 }
   0x9   :  { %143 = vmatmul.mubr.msk.bf16.vlgmr.msra.gmra.mrb[0].mxu0 %vm45_vm2, %v153_v3  ;;  %p161_p3 = por %p160_p2, %p159_p1 }
   0xb   :  { %v20_v4 = vld [vmem:[#allocation2] sm:$0xff]  ;;  %p162_p4 = pnand %p161_p3, %p155_p0 }
   0xc   :  { %v21_v6 = vld [vmem:[#allocation2 + $0x8] sm:$0xff] }
  0xdc   :  { %v83_v5 = vpop.f32.mrb[0].mxu0 }
  0xdd   :  { %v90_v7 = vadd.f32 %v83_v5, %v20_v4  ;;  %v144_v8 = vpop.f32.mrb[1].mxu0 }
  0xde   :  { %v86_v9 = vpop.f32.mrb[2].mxu0 }
  0xdf   :  { %93 = vst.msk [vmem:[#allocation2] sm:$0xff] %vm17_vm1, %v90_v7  ;;  %v91_v10 = vadd.f32 %v86_v9, %v21_v6  ;;  %v145_v11 = vpop.f32.mrb[3].mxu0 }
  0xe1   :  { %94 = vst.msk [vmem:[#allocation2 + $0x8] sm:$0xff] %vm17_vm1, %v91_v10 }
  0xe6   :  { %v98_v12 = vld [vmem:[#allocation2] sm:$0xff] }
  0xe7   :  { %v133_v13 = vpack.c.bf16 %v98_v12, %v98_v12 }
  0xe8   :  { %v99_v14 = vld [vmem:[#allocation2 + $0x8] sm:$0xff] }
  0xe9   :  { %v134_v15 = vpack.c.bf16 %v99_v14, %v99_v14  ;;  %109 = vst.msk [vmem:[#allocation3] sm:$0xf] %vm108_vm3, %v133_v13 }
  0xeb   :  { %110 = vst.msk [vmem:[#allocation3 + $0x4] sm:$0xf] %vm108_vm3, %v134_v15 }
  0xec   :  { %165 = shalt.err (!%p162_p4)
}
  0xed   :  { %s166_s18 = scalar_lea.hbm %s225_s2, 128 }
  0xee   :  { %p167_p5 = scmp.ne.s32.totalorder %s225_s2, %s166_s18  ;;  %p170_p6 = scmp.lt.u32.totalorder %s166_s18, %s225_s2 }
  0xf0   :  { %p172_p7 = pnand %p170_p6, %p167_p5 }
  0xf2   :  { %175 = shalt.err (!%p172_p7)
}
  0xf3   :  { %s181_s23 = smov 64   ;;  %s182_s24 = smov 4  }
  0xf4   :  { %122 = dma.vmem_to_hbm [thread:$0]  %s117_s15, 128, %s225_s2, [#allocation4], %s181_s23, %s181_s23, %s182_s24  }
  0xf5   :  { %176 = dma.done.wait [#allocation4], 128  }
  0xf6   :  { %177 = vsyncadd [#allocation4], 4294967168 }
  0xf7   :  { %126 = vsyncpa [#allocation4], 1 }

</bundles_post_ra>
